<compile_context>
chip_gen: v7x
topology: tpu7x:2x2x1
jax: 0.10.0
libtpu: 0.0.40
codegen_flags: <defaults>
</compile_context>

<pallas_src>
import functools

import jax
import jax.numpy as jnp
from jax.experimental import pallas as pl
from jax.experimental.pallas import tpu as pltpu

_NEG = -1e30  # class/batch pad value: exp(_NEG - m) underflows to exactly 0


def _round_up(x, m):
    return (x + m - 1) // m * m


def _choose_tile_b(batch, c_pad):
    # Size on the in-kernel f32 working set (inputs are upcast to f32), not on
    # the input itemsize: ~2 MiB f32 logits tiles keep the total footprint
    # (double-buffered inputs + a handful of live f32 temporaries) well inside
    # every generation's scoped VMEM, while staying near the HBM roofline.
    target_f32_bytes = 2 * 1024 * 1024
    rows = (target_f32_bytes // (c_pad * 4)) // 8 * 8
    rows = int(max(8, min(rows, 1024)))

    b_pad_min = _round_up(batch, 8)
    rows = min(rows, b_pad_min)

    # Guarantee >= 2 grid blocks whenever the batch allows so the "parallel"
    # grid axis can be split across v7x's two TensorCores (v5e/v6e: 1 TC,
    # unaffected).
    if rows >= b_pad_min and b_pad_min > 8:
        rows = max(8, _round_up((b_pad_min + 1) // 2, 8))
    return rows


def _vmem_limit_bytes(tile_b, c_pad, in_itemsize):
    # Explicit scoped-VMEM budget: double-buffered logits input, the labels
    # block (a (tile_b, 2) i32 block still occupies full 128-lane tiles),
    # ~6 live full-tile f32 temporaries in the body, double-buffered (8, 128)
    # output partials, plus margin.  Floor at 32 MiB, cap at v7x's 64 MiB
    # physical VMEM.
    est = (2 * tile_b * c_pad * in_itemsize
           + 2 * tile_b * 128 * 4
           + 6 * tile_b * c_pad * 4
           + 2 * 8 * 128 * 4
           + (2 << 20))
    return int(min(max(est, 32 << 20), 64 << 20))


def _custom_ce_kernel(x_ref, lab_ref, out_ref, *, tile_b, b_real, c_pad,
                      include_mse, mask_rows):
    # x_ref   : (tile_b, c_pad) logits tile (f32 or bf16), upcast in-kernel
    # lab_ref : (tile_b, 2) int32 -- [:, 0] target class, [:, 1] noise label
    #           (padded rows carry the out-of-range class id c_pad)
    # out_ref : (8, 128) f32 per-block partial sums
    x = x_ref[...].astype(jnp.float32)                        # (tile_b, c_pad)

    # Row-wise numerically-stable softmax statistics (full-tile work: one sub,
    # one exp (EUP) and the lane reductions below -- no logp/p materialized).
    m = jnp.max(x, axis=1, keepdims=True)                     # (tile_b, 1)
    e = jnp.exp(x - m)                                        # (tile_b, c_pad)
    denom = jnp.sum(e, axis=1, keepdims=True)                 # (tile_b, 1)

    class_ids = jax.lax.broadcasted_iota(jnp.int32, (tile_b, c_pad), 1)
    tgt = lab_ref[:, 0:1]                                     # (tile_b, 1)
    sel_t = class_ids == tgt

    # Target logit gathered via a masked lane reduction (no one-hot tensor).
    x_t = jnp.sum(jnp.where(sel_t, x, 0.0), axis=1, keepdims=True)
    # CE per row: -(x_t - m - log(denom))
    ce_r = m + jnp.log(denom) - x_t                           # (tile_b, 1)

    if include_mse:
        noise = lab_ref[:, 1:2]
        sel_n = class_ids == noise
        e2_r = jnp.sum(e * e, axis=1, keepdims=True)          # (tile_b, 1)
        en_r = jnp.sum(jnp.where(sel_n, e, 0.0), axis=1, keepdims=True)
        inv = 1.0 / denom                                     # exact, per-row
        p2_r = e2_r * inv * inv                               # sum(p^2) per row
        pn_r = en_r * inv                                     # p at noise class
    else:
        p2_r = jnp.zeros((tile_b, 1), jnp.float32)
        pn_r = jnp.zeros((tile_b, 1), jnp.float32)

    if mask_rows:
        # Cheap per-ROW mask on (tile_b, 1) partials only (padded label rows
        # already carry out-of-range ids, so x_t / en_r are zero there; only
        # the m + log(denom) and uniform-p^2 terms need zeroing).
        row_ids = (pl.program_id(0) * tile_b
                   + jax.lax.broadcasted_iota(jnp.int32, (tile_b, 1), 0))
        valid = row_ids < b_real
        ce_r = jnp.where(valid, ce_r, 0.0)
        p2_r = jnp.where(valid, p2_r, 0.0)

    ce_sum = jnp.sum(ce_r)
    p2_sum = jnp.sum(p2_r)
    pn_sum = jnp.sum(pn_r)

    lane = jax.lax.broadcasted_iota(jnp.int32, (8, 128), 1)
    out_ref[...] = (jnp.where(lane == 0, ce_sum, 0.0)
                    + jnp.where(lane == 1, p2_sum, 0.0)
                    + jnp.where(lane == 2, pn_sum, 0.0))


def custom_ce_loss(outputs, targets, noise_labels=None, eps=0.0, test=False):
    """outputs: (B, C) f32/bf16 logits; targets/noise_labels: (B,) int; eps: float."""
    B, C = outputs.shape
    c_pad = _round_up(C, 128)

    tgt = targets.astype(jnp.int32).reshape(B, 1)
    if test or noise_labels is None:
        noise = jnp.zeros((B, 1), jnp.int32)      # statically unused in kernel
    else:
        noise = noise_labels.astype(jnp.int32).reshape(B, 1)
    labels = jnp.concatenate([tgt, noise], axis=1)            # (B, 2) int32

    tile_b = _choose_tile_b(B, c_pad)
    b_pad = _round_up(B, tile_b)
    num_blocks = b_pad // tile_b
    mask_rows = b_pad != B
    itemsize = jnp.dtype(outputs.dtype).itemsize

    x = outputs
    if c_pad != C or b_pad != B:
        x = jnp.pad(x, ((0, b_pad - B), (0, c_pad - C)),
                    constant_values=jnp.asarray(_NEG, dtype=outputs.dtype))
    if b_pad != B:
        # Out-of-range class id for padded rows: target/noise selectors never
        # match there, so no per-element masking is needed in the kernel.
        labels = jnp.pad(labels, ((0, b_pad - B), (0, 0)),
                         constant_values=c_pad)

    kernel = functools.partial(
        _custom_ce_kernel, tile_b=tile_b, b_real=B, c_pad=c_pad,
        include_mse=not test, mask_rows=mask_rows)

    partials = pl.pallas_call(
        kernel,
        out_shape=jax.ShapeDtypeStruct((num_blocks * 8, 128), jnp.float32),
        grid_spec=pltpu.PrefetchScalarGridSpec(
            num_scalar_prefetch=0,
            grid=(num_blocks,),
            in_specs=[
                pl.BlockSpec((tile_b, c_pad), lambda i: (i, 0)),
                pl.BlockSpec((tile_b, 2), lambda i: (i, 0)),
            ],
            out_specs=pl.BlockSpec((8, 128), lambda i: (i, 0)),
        ),
        compiler_params=pltpu.CompilerParams(
            dimension_semantics=("parallel",),
            vmem_limit_bytes=_vmem_limit_bytes(tile_b, c_pad, itemsize)),
    )(x, labels)

    parts = partials.reshape(num_blocks, 8, 128)[:, 0, :]     # (num_blocks, 128)
    denom = jnp.float32(B * C)
    loss = jnp.sum(parts[:, 0]) / denom                       # mean(ce) over B*C
    if not test:
        p2_sum = jnp.sum(parts[:, 1])
        pn_sum = jnp.sum(parts[:, 2])
        # sum((p - onehot_n)^2) = sum(p^2) - 2*sum(p at noise) + B
        mse = (p2_sum - 2.0 * pn_sum + jnp.float32(B)) / denom
        loss = loss - jnp.float32(eps) * mse
    return loss


def _reference(outputs, targets, noise_labels, eps, test=False):
    x = outputs.astype(jnp.float32)
    logp = jax.nn.log_softmax(x, axis=1)
    onehot_t = jax.nn.one_hot(targets, x.shape[1], dtype=jnp.float32)
    loss = -onehot_t * logp
    if not test:
        p = jax.nn.softmax(x, axis=1)
        onehot_n = jax.nn.one_hot(noise_labels, x.shape[1], dtype=jnp.float32)
        mse = jnp.mean((p - onehot_n) ** 2)
        loss = loss - eps * mse
    return jnp.mean(loss)


if __name__ == "__main__":
    key = jax.random.PRNGKey(0)
    k1, k2, k3, k4, k5, k6 = jax.random.split(key, 6)

    eps = 0.1

    # --- Case 1: small aligned-ish shape, f32 logits ------------------------
    B, C = 8, 16
    outputs = jax.random.normal(k1, (B, C), dtype=jnp.float32)
    targets = jax.random.randint(k2, (B,), 0, C, dtype=jnp.int32)
    # Deterministic stand-in for dataset[srng.gen()][1] high-noise labels.
    noise_labels = jax.random.randint(k3, (B,), 0, C, dtype=jnp.int32)

    loss = jax.block_until_ready(
        custom_ce_loss(outputs, targets, noise_labels, eps, test=False))
    ref = _reference(outputs, targets, noise_labels, eps, test=False)
    assert jnp.allclose(loss, ref, atol=2e-4, rtol=2e-4), (loss, ref)

    # Test mode (CE only) — separate statically compiled variant.
    loss_t = jax.block_until_ready(
        custom_ce_loss(outputs, targets, noise_labels, eps, test=True))
    ref_t = _reference(outputs, targets, noise_labels, eps, test=True)
    assert jnp.allclose(loss_t, ref_t, atol=2e-4, rtol=2e-4), (loss_t, ref_t)

    # bf16 logits accepted directly (upcast happens inside the kernel).
    out_bf16 = outputs.astype(jnp.bfloat16)
    loss_b = jax.block_until_ready(
        custom_ce_loss(out_bf16, targets, noise_labels, eps, test=False))
    ref_b = _reference(out_bf16, targets, noise_labels, eps, test=False)
    assert jnp.allclose(loss_b, ref_b, atol=2e-4, rtol=2e-4), (loss_b, ref_b)

    # --- Case 2: ragged shape exercising batch-row masking, class padding and
    # the >= 2 grid blocks (v7x TC split) path -------------------------------
    B2, C2 = 37, 200
    outputs2 = jax.random.normal(k4, (B2, C2), dtype=jnp.float32)
    targets2 = jax.random.randint(k5, (B2,), 0, C2, dtype=jnp.int32)
    noise2 = jax.random.randint(k6, (B2,), 0, C2, dtype=jnp.int32)

    loss2 = jax.block_until_ready(
        custom_ce_loss(outputs2, targets2, noise2, eps, test=False))
    ref2 = _reference(outputs2, targets2, noise2, eps, test=False)
    assert jnp.allclose(loss2, ref2, atol=2e-4, rtol=2e-4), (loss2, ref2)

    print("KERNEL_OK")
</pallas_src>

<mosaic_0001>
module attributes {stable_mosaic.version = 11 : i64} {
  func.func @_custom_ce_kernel(%arg0: i32, %arg1: memref<8x128xf32, #tpu.memory_space<vmem>>, %arg2: memref<8x2xi32, #tpu.memory_space<vmem>>, %arg3: memref<8x128xf32, #tpu.memory_space<vmem>>) attributes {dimension_semantics = [#tpu.dimension_semantics<parallel>], iteration_bounds = array<i64: 1>, scalar_prefetch = 0 : i64, scratch_operands = 0 : i64, tpu.core_type = #tpu.core_type<tc>, window_params = [{transform_indices = @transform_0, window_bounds = array<i64: 8, 128>}, {transform_indices = @transform_1, window_bounds = array<i64: 8, 2>}, {transform_indices = @transform_2, window_bounds = array<i64: 8, 128>}]} {
    %c0 = arith.constant 0 : index
    %c0_0 = arith.constant 0 : index
    %0 = vector.load %arg1[%c0, %c0_0] : memref<8x128xf32, #tpu.memory_space<vmem>>, vector<8x128xf32>
    %cst = arith.constant dense<0xFF800000> : vector<8xf32>
    %1 = vector.multi_reduction <maximumf>, %0, %cst [1] : vector<8x128xf32> to vector<8xf32>
    %2 = vector.shape_cast %1 : vector<8xf32> to vector<8x1xf32>
    %3 = vector.broadcast %2 : vector<8x1xf32> to vector<8x128xf32>
    %4 = arith.subf %0, %3 : vector<8x128xf32>
    %5 = math.exp %4 : vector<8x128xf32>
    %cst_1 = arith.constant dense<0.000000e+00> : vector<8xf32>
    %6 = vector.multi_reduction <add>, %5, %cst_1 [1] : vector<8x128xf32> to vector<8xf32>
    %7 = vector.shape_cast %6 : vector<8xf32> to vector<8x1xf32>
    %8 = tpu.iota {dimensions = array<i32: 1>} : vector<8x128xi32>
    %c0_2 = arith.constant 0 : index
    %c0_3 = arith.constant 0 : index
    %9 = vector.load %arg2[%c0_2, %c0_3] : memref<8x2xi32, #tpu.memory_space<vmem>>, vector<8x1xi32>
    %10 = vector.broadcast %9 : vector<8x1xi32> to vector<8x128xi32>
    %11 = arith.cmpi eq, %8, %10 : vector<8x128xi32>
    %cst_4 = arith.constant 0.000000e+00 : f32
    %12 = vector.broadcast %cst_4 : f32 to vector<8x128xf32>
    %13 = arith.select %11, %0, %12 : vector<8x128xi1>, vector<8x128xf32>
    %cst_5 = arith.constant dense<0.000000e+00> : vector<8xf32>
    %14 = vector.multi_reduction <add>, %13, %cst_5 [1] : vector<8x128xf32> to vector<8xf32>
    %15 = vector.shape_cast %14 : vector<8xf32> to vector<8x1xf32>
    %16 = math.log %7 : vector<8x1xf32>
    %17 = arith.addf %2, %16 : vector<8x1xf32>
    %18 = arith.subf %17, %15 : vector<8x1xf32>
    %c0_6 = arith.constant 0 : index
    %c1 = arith.constant 1 : index
    %19 = vector.load %arg2[%c0_6, %c1] : memref<8x2xi32, #tpu.memory_space<vmem>>, vector<8x1xi32>
    %20 = vector.broadcast %19 : vector<8x1xi32> to vector<8x128xi32>
    %21 = arith.cmpi eq, %8, %20 : vector<8x128xi32>
    %22 = arith.mulf %5, %5 : vector<8x128xf32>
    %cst_7 = arith.constant dense<0.000000e+00> : vector<8xf32>
    %23 = vector.multi_reduction <add>, %22, %cst_7 [1] : vector<8x128xf32> to vector<8xf32>
    %24 = vector.shape_cast %23 : vector<8xf32> to vector<8x1xf32>
    %cst_8 = arith.constant 0.000000e+00 : f32
    %25 = vector.broadcast %cst_8 : f32 to vector<8x128xf32>
    %26 = arith.select %21, %5, %25 : vector<8x128xi1>, vector<8x128xf32>
    %cst_9 = arith.constant dense<0.000000e+00> : vector<8xf32>
    %27 = vector.multi_reduction <add>, %26, %cst_9 [1] : vector<8x128xf32> to vector<8xf32>
    %28 = vector.shape_cast %27 : vector<8xf32> to vector<8x1xf32>
    %cst_10 = arith.constant 1.000000e+00 : f32
    %29 = vector.broadcast %cst_10 : f32 to vector<8x1xf32>
    %30 = arith.divf %29, %7 : vector<8x1xf32>
    %31 = arith.mulf %24, %30 : vector<8x1xf32>
    %32 = arith.mulf %31, %30 : vector<8x1xf32>
    %33 = arith.mulf %28, %30 : vector<8x1xf32>
    %34 = vector.shape_cast %18 : vector<8x1xf32> to vector<1x8x1xf32>
    %cst_11 = arith.constant dense<0.000000e+00> : vector<1xf32>
    %35 = vector.multi_reduction <add>, %34, %cst_11 [1, 2] : vector<1x8x1xf32> to vector<1xf32>
    %36 = vector.shape_cast %35 : vector<1xf32> to vector<1x1x1xf32>
    %37 = vector.extract %36[0, 0, 0] : f32 from vector<1x1x1xf32>
    %38 = vector.shape_cast %32 : vector<8x1xf32> to vector<1x8x1xf32>
    %cst_12 = arith.constant dense<0.000000e+00> : vector<1xf32>
    %39 = vector.multi_reduction <add>, %38, %cst_12 [1, 2] : vector<1x8x1xf32> to vector<1xf32>
    %40 = vector.shape_cast %39 : vector<1xf32> to vector<1x1x1xf32>
    %41 = vector.extract %40[0, 0, 0] : f32 from vector<1x1x1xf32>
    %42 = vector.shape_cast %33 : vector<8x1xf32> to vector<1x8x1xf32>
    %cst_13 = arith.constant dense<0.000000e+00> : vector<1xf32>
    %43 = vector.multi_reduction <add>, %42, %cst_13 [1, 2] : vector<1x8x1xf32> to vector<1xf32>
    %44 = vector.shape_cast %43 : vector<1xf32> to vector<1x1x1xf32>
    %45 = vector.extract %44[0, 0, 0] : f32 from vector<1x1x1xf32>
    %46 = tpu.iota {dimensions = array<i32: 1>} : vector<8x128xi32>
    %c0_i32 = arith.constant 0 : i32
    %47 = vector.broadcast %c0_i32 : i32 to vector<8x128xi32>
    %48 = arith.cmpi eq, %46, %47 : vector<8x128xi32>
    %cst_14 = arith.constant 0.000000e+00 : f32
    %49 = vector.broadcast %37 : f32 to vector<8x128xf32>
    %50 = vector.broadcast %cst_14 : f32 to vector<8x128xf32>
    %51 = arith.select %48, %49, %50 : vector<8x128xi1>, vector<8x128xf32>
    %c1_i32 = arith.constant 1 : i32
    %52 = vector.broadcast %c1_i32 : i32 to vector<8x128xi32>
    %53 = arith.cmpi eq, %46, %52 : vector<8x128xi32>
    %cst_15 = arith.constant 0.000000e+00 : f32
    %54 = vector.broadcast %41 : f32 to vector<8x128xf32>
    %55 = vector.broadcast %cst_15 : f32 to vector<8x128xf32>
    %56 = arith.select %53, %54, %55 : vector<8x128xi1>, vector<8x128xf32>
    %57 = arith.addf %51, %56 : vector<8x128xf32>
    %c2_i32 = arith.constant 2 : i32
    %58 = vector.broadcast %c2_i32 : i32 to vector<8x128xi32>
    %59 = arith.cmpi eq, %46, %58 : vector<8x128xi32>
    %cst_16 = arith.constant 0.000000e+00 : f32
    %60 = vector.broadcast %45 : f32 to vector<8x128xf32>
    %61 = vector.broadcast %cst_16 : f32 to vector<8x128xf32>
    %62 = arith.select %59, %60, %61 : vector<8x128xi1>, vector<8x128xf32>
    %63 = arith.addf %57, %62 : vector<8x128xf32>
    %c0_17 = arith.constant 0 : index
    %c0_18 = arith.constant 0 : index
    %64 = vector.load %arg3[%c0_17, %c0_18] : memref<8x128xf32, #tpu.memory_space<vmem>>, vector<8x128xf32>
    tpu.vector_store %arg3[%c0_17, %c0_18], %63 {strides = array<i32>} : memref<8x128xf32, #tpu.memory_space<vmem>>, vector<8x128xf32>,
    return
  }
  func.func @transform_0(%arg0: i32) -> (i32, i32) {
    %c0_i32 = arith.constant 0 : i32
    %c0_i32_0 = arith.constant 0 : i32
    return %arg0, %c0_i32 : i32, i32
  }
  func.func @transform_1(%arg0: i32) -> (i32, i32) {
    %c0_i32 = arith.constant 0 : i32
    %c0_i32_0 = arith.constant 0 : i32
    return %arg0, %c0_i32 : i32, i32
  }
  func.func @transform_2(%arg0: i32) -> (i32, i32) {
    %c0_i32 = arith.constant 0 : i32
    %c0_i32_0 = arith.constant 0 : i32
    return %arg0, %c0_i32 : i32, i32
  }
}

</mosaic_0001>

<bundles_post_ra>
// kernel: tpu_custom_call.1
= control target key start
LH: loop header
LB: loop body
LE: loop exit
PB: predicated region body
PF: predicated region fallthrough
CT: control target
= control target key end

     0   :  { %s191_s0 = inlined_call_operand.vmem [shape: f32[8,128], index: 0, kind: input, shape index: {}]   ;;  %s192_s1 = inlined_call_operand.vmem [shape: s32[8,2], index: 1, kind: input, shape index: {}]   ;;  %s193_s2 = inlined_call_operand.hbm [shape: f32[8,128], index: 2, kind: output, shape index: {}]  }
   0x1   :  { %v12_v0 = vld [vmem:[%s191_s0] sm:$0xff] }
   0x2   :  { %v22_v1 = vld [vmem:[%s192_s1] sm:$0xff] }
   0x3   :  { %7 = vsyncpa [#allocation3], 0  ;;  %13 = vmax.xlane.f32.xlu0 %v12_v0  ;;  %v148_v2 = vmov 1   ;;  %v149_v3 = vmov 0   ;;  %v20_v7 = vlaneseq  ;;  %vm49_vm2 = vcmask 7168   ;;  %s150_s14 = smov [#allocation2]  }
   0x4   :  { %116 = vset.pattern.permute.xlu1 %v148_v2  ;;  %115 = vset.pattern.permute.xlu0 %v149_v3  ;;  %s98_s15 = sshll.u32 %s150_s14, 4  ;;  %s99_s15 = int_to_ptr.vmem [resolvable:$true] %s98_s15 }
   0x5   :  { %35 = vperm.xlu1 %116, %v22_v1   ;;  %v172_v8 = vand.u32 127, %v20_v7  ;;  %s124_s16 = scalar_lea.vmem %s99_s15, 128  ;;  %p129_p1 = scmp.lt.s32.totalorder %s99_s15, %s99_s15 }
   0x6   :  { %p125_p0 = scmp.ne.s32.totalorder %s99_s15, %s124_s16  ;;  %p130_p2 = scmp.lt.s32.totalorder %s124_s16, %s124_s16 }
   0x7   :  { %vm80_vm3 = vcmp.eq.s32.totalorder %v172_v8, 0  ;;  %vm83_vm4 = vcmp.eq.s32.totalorder %v172_v8, 1  ;;  %vm87_vm5 = vcmp.eq.s32.totalorder %v172_v8, 2 }
   0x8   :  { %p131_p3 = por %p130_p2, %p129_p1 }
   0xa   :  { %p132_p4 = pnand %p131_p3, %p125_p0 }
  0x19   :  { %24 = vperm.xlu0 %115, %v22_v1  }
  0x1d   :  { %117 = vset.pattern.permute.xlu0 %v148_v2 }
  0x84   :  { %v36_v9 = vpop.permute.xlu1 %35 }
  0x85   :  { %vm37_vm0 = vcmp.eq.s32.totalorder %v172_v8, %v36_v9 }
  0x90   :  { %v14_v4 = vpop.xlane.xlu0 %13 }
  0x91   :  { %v15_v5 = vsub.f32 %v12_v0, %v14_v4 }
  0x93   :  { %v16_v6 = vmul.f32 1.442695, %v15_v5 }
  0x95   :  { %118 = vpow2.f32 %v16_v6 }
  0x98   :  { %v25_v11 = vpop.permute.xlu0 %24 }
  0x99   :  { %vm26_vm1 = vcmp.eq.s32.totalorder %v172_v8, %v25_v11 }
  0x9a   :  { %v27_v14 = vsel %vm26_vm1, %v12_v0, 0.0 }
  0x9f   :  { %v119_v10 = vpop.eup %118 }
  0xa0   :  { %18 = vadd.xlane.f32.xlu1 %v119_v10  ;;  %v41_v12 = vsel %vm37_vm0, %v119_v10, 0.0  ;;  %v38_v13 = vmul.f32 %v119_v10, %v119_v10 }
  0xa1   :  { %42 = vadd.xlane.f32.xlu0 %v41_v12 }
  0xa4   :  { %39 = vadd.xlane.f32.xlu1 %v38_v13 }
  0xa8   :  { %28 = vadd.xlane.f32.xlu1 %v27_v14 }
 0x12d   :  { %v19_v15 = vpop.xlane.xlu1 %18 }
 0x12e   :  { %120 = vlog2.f32 %v19_v15  ;;  %v43_v26 = vpop.xlane.xlu0 %42 }
 0x12f   :  { %122 = vrcp.f32 %v19_v15 }
 0x131   :  { %v40_v16 = vpop.xlane.xlu1 %39 }
 0x135   :  { %v29_v22 = vpop.xlane.xlu1 %28 }
 0x138   :  { %v121_v17 = vpop.eup %120 }
 0x139   :  { %v123_v18 = vpop.eup %122  ;;  %v31_v19 = vmul.f32 0.6931472, %v121_v17 }
 0x13a   :  { %v46_v20 = vmul.f32 %v123_v18, %v40_v16  ;;  %v48_v27 = vmul.f32 %v123_v18, %v43_v26 }
 0x13b   :  { %v32_v21 = vadd.f32 %v31_v19, %v14_v4 }
 0x13c   :  { %v47_v23 = vmul.f32 %v123_v18, %v46_v20  ;;  %v70_v29 = vsel %vm49_vm2, %v48_v27, 0.0 }
 0x13d   :  { %v33_v24 = vsub.f32 %v32_v21, %v29_v22 }
 0x13e   :  { %v60_v25 = vsel %vm49_vm2, %v47_v23, 0.0 }
 0x13f   :  { %61 = vadd.xlane.f32.xlu1 %v60_v25  ;;  %v50_v28 = vsel %vm49_vm2, %v33_v24, 0.0 }
 0x143   :  { %51 = vadd.xlane.f32.xlu1 %v50_v28 }
 0x147   :  { %71 = vadd.xlane.f32.xlu1 %v70_v29 }
 0x1cc   :  { %v62_v30 = vpop.xlane.xlu1 %61 }
 0x1cd   :  { %v63_v31 = vrot.slane %v62_v30, 4 }
 0x1cf   :  { %v64_v32 = vadd.f32 %v63_v31, %v62_v30 }
 0x1d0   :  { %v52_v33 = vpop.xlane.xlu1 %51 }
 0x1d1   :  { %v65_v34 = vrot.slane %v64_v32, 2  ;;  %v53_v35 = vrot.slane %v52_v33, 4 }
 0x1d3   :  { %v54_v36 = vadd.f32 %v53_v35, %v52_v33  ;;  %v66_v38 = vadd.f32 %v65_v34, %v64_v32 }
 0x1d4   :  { %v72_v37 = vpop.xlane.xlu1 %71 }
 0x1d5   :  { %v55_v39 = vrot.slane %v54_v36, 2  ;;  %v73_v40 = vrot.slane %v72_v37, 4  ;;  %v67_v43 = vrot.slane %v66_v38, 1 }
 0x1d7   :  { %v74_v41 = vadd.f32 %v73_v40, %v72_v37  ;;  %v56_v42 = vadd.f32 %v55_v39, %v54_v36  ;;  %v68_v48 = vadd.f32 %v67_v43, %v66_v38 }
 0x1d9   :  { %v75_v44 = vrot.slane %v74_v41, 2  ;;  %v57_v45 = vrot.slane %v56_v42, 1 }
 0x1db   :  { %v76_v46 = vadd.f32 %v75_v44, %v74_v41  ;;  %v58_v47 = vadd.f32 %v57_v45, %v56_v42 }
 0x1dd   :  { %106 = vpush %v58_v47  ;;  %v77_v49 = vrot.slane %v76_v46, 1 }
 0x1de   :  { %108 = vpush %v68_v48 }
 0x1df   :  { %v78_v50 = vadd.f32 %v77_v49, %v76_v46 }
 0x1e1   :  { %110 = vpush %v78_v50 }
 0x20e   :  { %s107_s0 = spop %106 }
 0x20f   :  { %v81_v51 = vstv %s107_s0  ;;  %s109_s1 = spop %108 }
 0x210   :  { %v82_v52 = vsel %vm80_vm3, %v81_v51, 0.0  ;;  %v84_v53 = vstv %s109_s1 }
 0x211   :  { %v85_v54 = vsel %vm83_vm4, %v84_v53, 0.0 }
 0x212   :  { %s111_s13 = spop %110  ;;  %v86_v55 = vadd.f32 %v85_v54, %v82_v52 }
 0x213   :  { %v88_v56 = vstv %s111_s13 }
 0x214   :  { %v89_v57 = vsel %vm87_vm5, %v88_v56, 0.0 }
 0x215   :  { %v90_v58 = vadd.f32 %v89_v57, %v86_v55 }
 0x217   :  { %91 = vst [vmem:[#allocation2] sm:$0xff] %v90_v58 }
 0x218   :  { %135 = shalt.err (!%p132_p4)
}
 0x219   :  { %s136_s19 = scalar_lea.hbm %s193_s2, 128 }
 0x21a   :  { %p137_p5 = scmp.ne.s32.totalorder %s193_s2, %s136_s19  ;;  %p140_p6 = scmp.lt.u32.totalorder %s136_s19, %s193_s2 }
 0x21c   :  { %p142_p7 = pnand %p140_p6, %p137_p5 }
 0x21e   :  { %145 = shalt.err (!%p142_p7)
}
 0x21f   :  { %101 = dma.vmem_to_hbm [thread:$0]  %s99_s15, 128, %s193_s2, [#allocation3]  }
 0x220   :  { %146 = dma.done.wait [#allocation3], 128  }
 0x221   :  { %147 = vsyncadd [#allocation3], 4294967168 }
 0x222   :  { %105 = vsyncpa [#allocation3], 1 }

</bundles_post_ra>
